<compile_context>
chip_gen: v6e
topology: v6e:2x2x1
jax: 0.10.0
libtpu: 0.0.40
codegen_flags: <defaults>
</compile_context>

<pallas_src>
import math

import jax
import jax.numpy as jnp
from jax import lax
from jax.experimental import pallas as pl
from jax.experimental.pallas import tpu as pltpu


def _round_up(a, b):
    return ((a + b - 1) // b) * b


def _gelu_exact(v):
    # nn.GELU() default (approximate='none'): 0.5*x*(1+erf(x/sqrt(2))).
    # erf lowers to a VPU polynomial; kept f32 (v5e has no bf16 VPU/EUP).
    return 0.5 * v * (1.0 + lax.erf(v * (1.0 / math.sqrt(2.0))))


def ffn_kernel(x_ref, w1_ref, b1_ref, w2_ref, b2_ref, o_ref):
    # x_ref: (TM, E) token block.  Weights/biases are whole-array blocks whose constant
    # index_maps keep them VMEM-resident across grid steps.
    x = x_ref[...]                                                                   # (TM, E)
    h = jnp.dot(x, w1_ref[...], preferred_element_type=jnp.float32) + b1_ref[...]    # (TM, H)
    h = _gelu_exact(h)
    # Dropout(p=0.0) is the identity, so it is omitted.  A nonzero drop_rate would need
    # pltpu.prng_seed / pltpu.prng_random_bits here.
    y = jnp.dot(h, w2_ref[...], preferred_element_type=jnp.float32) + b2_ref[...]    # (TM, E)
    o_ref[...] = y.astype(o_ref.dtype)


def feedforward_net(x, kparams, *, tm=128):
    """x: (..., E) float32. Applies Linear(E,H) -> GELU -> Linear(H,E) (dropout=identity)."""
    lead = x.shape[:-1]
    E = x.shape[-1]
    H = kparams["w1_t"].shape[-1]

    x2d = x.reshape(-1, E)                      # fuse leading dims onto sublanes (free reshape)
    M = x2d.shape[0]

    # Row-tile size: full 128 rows when enough tokens, otherwise the smallest 8-aligned
    # block that covers M (keeps the sublane constraint and avoids useless padding rows).
    tm = min(tm, _round_up(M, 8))
    Mp = _round_up(M, tm)
    if Mp != M:
        x2d = jnp.pad(x2d, ((0, Mp - M), (0, 0)))
    grid = (Mp // tm,)

    vmem = pltpu.MemorySpace.VMEM
    cost = pl.CostEstimate(
        flops=4 * Mp * E * H,                    # 2*Mp*E*H per matmul, two matmuls
        transcendentals=Mp * H,                  # one erf per hidden activation
        bytes_accessed=4 * (2 * Mp * E + 2 * E * H + H + E),
    )

    out = pl.pallas_call(
        ffn_kernel,
        out_shape=jax.ShapeDtypeStruct((Mp, E), jnp.float32),
        grid_spec=pltpu.PrefetchScalarGridSpec(
            num_scalar_prefetch=0,
            grid=grid,
            in_specs=[
                # activations stream one (tm, E) block per grid step
                pl.BlockSpec((tm, E), lambda i: (i, 0), memory_space=vmem),
                # parameters: constant block index -> DMA'd once, VMEM-resident
                pl.BlockSpec((E, H), lambda i: (0, 0), memory_space=vmem),
                pl.BlockSpec((1, H), lambda i: (0, 0), memory_space=vmem),
                pl.BlockSpec((H, E), lambda i: (0, 0), memory_space=vmem),
                pl.BlockSpec((1, E), lambda i: (0, 0), memory_space=vmem),
            ],
            out_specs=pl.BlockSpec((tm, E), lambda i: (i, 0), memory_space=vmem),
        ),
        compiler_params=pltpu.CompilerParams(
            # token axis is embarrassingly parallel -> sharded across both v7x TCs
            dimension_semantics=("parallel",),
        ),
        cost_estimate=cost,
    )(x2d, kparams["w1_t"], kparams["b1"], kparams["w2_t"], kparams["b2"])

    out = out[:M]
    return out.reshape(*lead, E)


def init_params(key, embed_dim, hidden_dim):
    """Parameters in PyTorch nn.Linear convention: weight is (out_features, in_features)."""
    k1, k2, k3, k4 = jax.random.split(key, 4)
    s = 0.05
    return {
        "w1": s * jax.random.normal(k1, (hidden_dim, embed_dim), jnp.float32),  # Linear(E,H).weight
        "b1": s * jax.random.normal(k2, (hidden_dim,), jnp.float32),
        "w2": s * jax.random.normal(k3, (embed_dim, hidden_dim), jnp.float32),  # Linear(H,E).weight
        "b2": s * jax.random.normal(k4, (embed_dim,), jnp.float32),
    }


def prepare_kernel_params(p):
    """One-time host-side prep: pre-transpose weights (act @ W form, no in-kernel .T) and
    lift biases to (1, N) rows.  For v6e/v7x at scale, cast w*_t (and x) to bf16 here and
    keep f32 accumulation; left f32 for exact-reference numerics."""
    hidden = p["b1"].shape[0]
    embed = p["b2"].shape[0]
    return {
        "w1_t": jnp.asarray(p["w1"].T),          # (E, H)
        "b1": p["b1"].reshape(1, hidden),
        "w2_t": jnp.asarray(p["w2"].T),          # (H, E)
        "b2": p["b2"].reshape(1, embed),
    }


def reference(x, p):
    """Pure-JAX reference matching FeedForwardNet.forward (PyTorch semantics)."""
    f = x @ p["w1"].T + p["b1"]
    f = 0.5 * f * (1.0 + lax.erf(f / math.sqrt(2.0)))
    return f @ p["w2"].T + p["b2"]


if __name__ == "__main__":
    # Small but lane/MXU-friendly demo shapes (per perf review): E=128 fills every vreg
    # lane, H=256, and BATCH*SEQ = 256 tokens -> two parallel 128-row grid steps.
    BATCH, SEQ, EMBED, HIDDEN = 2, 128, 128, 256

    key = jax.random.PRNGKey(0)
    kx, kp = jax.random.split(key)

    x = jax.random.normal(kx, (BATCH, SEQ, EMBED), jnp.float32)
    params = init_params(kp, EMBED, HIDDEN)
    kparams = prepare_kernel_params(params)

    y = feedforward_net(x, kparams)
    y = jax.block_until_ready(y)

    y_ref = reference(x, params)
    assert y.shape == (BATCH, SEQ, EMBED)
    assert jnp.allclose(y, y_ref, rtol=2e-4, atol=2e-4), "mismatch vs reference"
    print("KERNEL_OK")
</pallas_src>

<mosaic_0001>
module attributes {stable_mosaic.version = 11 : i64} {
  func.func @ffn_kernel(%arg0: i32, %arg1: memref<128x128xf32, #tpu.memory_space<vmem>>, %arg2: memref<128x256xf32, #tpu.memory_space<vmem>>, %arg3: memref<1x256xf32, #tpu.memory_space<vmem>>, %arg4: memref<256x128xf32, #tpu.memory_space<vmem>>, %arg5: memref<1x128xf32, #tpu.memory_space<vmem>>, %arg6: memref<128x128xf32, #tpu.memory_space<vmem>>) attributes {dimension_semantics = [#tpu.dimension_semantics<parallel>], iteration_bounds = array<i64: 2>, scalar_prefetch = 0 : i64, scratch_operands = 0 : i64, tpu.core_type = #tpu.core_type<tc>, window_params = [{transform_indices = @transform_0, window_bounds = array<i64: 128, 128>}, {pipeline_mode = #tpu.pipeline_mode<synchronous>, transform_indices = @transform_1, window_bounds = array<i64: 128, 256>}, {pipeline_mode = #tpu.pipeline_mode<synchronous>, transform_indices = @transform_2, window_bounds = array<i64: 1, 256>}, {pipeline_mode = #tpu.pipeline_mode<synchronous>, transform_indices = @transform_3, window_bounds = array<i64: 256, 128>}, {pipeline_mode = #tpu.pipeline_mode<synchronous>, transform_indices = @transform_4, window_bounds = array<i64: 1, 128>}, {transform_indices = @transform_5, window_bounds = array<i64: 128, 128>}]} {
    %c0 = arith.constant 0 : index
    %c0_0 = arith.constant 0 : index
    %0 = vector.load %arg1[%c0, %c0_0] : memref<128x128xf32, #tpu.memory_space<vmem>>, vector<128x128xf32>
    %c0_1 = arith.constant 0 : index
    %c0_2 = arith.constant 0 : index
    %1 = vector.load %arg2[%c0_1, %c0_2] : memref<128x256xf32, #tpu.memory_space<vmem>>, vector<128x256xf32>
    %cst = arith.constant dense<0.000000e+00> : vector<128x256xf32>
    %2 = tpu.matmul %0, %1, %cst {dimension_numbers = #tpu.dot_dimension_numbers<[1], [0], [0], [1], [0, 0, 1, 1], [], []>} : vector<128x128xf32>, vector<128x256xf32>, vector<128x256xf32> -> vector<128x256xf32>
    %c0_3 = arith.constant 0 : index
    %c0_4 = arith.constant 0 : index
    %3 = vector.load %arg3[%c0_3, %c0_4] : memref<1x256xf32, #tpu.memory_space<vmem>>, vector<1x256xf32>
    %4 = vector.broadcast %3 : vector<1x256xf32> to vector<128x256xf32>
    %5 = arith.addf %2, %4 : vector<128x256xf32>
    %cst_5 = arith.constant 5.000000e-01 : f32
    %6 = vector.broadcast %cst_5 : f32 to vector<128x256xf32>
    %7 = arith.mulf %6, %5 : vector<128x256xf32>
    %cst_6 = arith.constant 0.707106769 : f32
    %8 = vector.broadcast %cst_6 : f32 to vector<128x256xf32>
    %9 = arith.mulf %5, %8 : vector<128x256xf32>
    %10 = math.erf %9 : vector<128x256xf32>
    %cst_7 = arith.constant 1.000000e+00 : f32
    %11 = vector.broadcast %cst_7 : f32 to vector<128x256xf32>
    %12 = arith.addf %11, %10 : vector<128x256xf32>
    %13 = arith.mulf %7, %12 : vector<128x256xf32>
    %c0_8 = arith.constant 0 : index
    %c0_9 = arith.constant 0 : index
    %14 = vector.load %arg4[%c0_8, %c0_9] : memref<256x128xf32, #tpu.memory_space<vmem>>, vector<256x128xf32>
    %cst_10 = arith.constant dense<0.000000e+00> : vector<128x128xf32>
    %15 = tpu.matmul %13, %14, %cst_10 {dimension_numbers = #tpu.dot_dimension_numbers<[1], [0], [0], [1], [0, 0, 1, 1], [], []>} : vector<128x256xf32>, vector<256x128xf32>, vector<128x128xf32> -> vector<128x128xf32>
    %c0_11 = arith.constant 0 : index
    %c0_12 = arith.constant 0 : index
    %16 = vector.load %arg5[%c0_11, %c0_12] : memref<1x128xf32, #tpu.memory_space<vmem>>, vector<1x128xf32>
    %17 = vector.broadcast %16 : vector<1x128xf32> to vector<128x128xf32>
    %18 = arith.addf %15, %17 : vector<128x128xf32>
    %c0_13 = arith.constant 0 : index
    %c0_14 = arith.constant 0 : index
    %19 = vector.load %arg6[%c0_13, %c0_14] : memref<128x128xf32, #tpu.memory_space<vmem>>, vector<128x128xf32>
    tpu.vector_store %arg6[%c0_13, %c0_14], %18 {strides = array<i32>} : memref<128x128xf32, #tpu.memory_space<vmem>>, vector<128x128xf32>,
    return
  }
  func.func @transform_0(%arg0: i32) -> (i32, i32) {
    %c0_i32 = arith.constant 0 : i32
    %c0_i32_0 = arith.constant 0 : i32
    return %arg0, %c0_i32 : i32, i32
  }
  func.func @transform_1(%arg0: i32) -> (i32, i32) {
    %c0_i32 = arith.constant 0 : i32
    %c0_i32_0 = arith.constant 0 : i32
    %c0_i32_1 = arith.constant 0 : i32
    return %c0_i32, %c0_i32_0 : i32, i32
  }
  func.func @transform_2(%arg0: i32) -> (i32, i32) {
    %c0_i32 = arith.constant 0 : i32
    %c0_i32_0 = arith.constant 0 : i32
    %c0_i32_1 = arith.constant 0 : i32
    return %c0_i32, %c0_i32_0 : i32, i32
  }
  func.func @transform_3(%arg0: i32) -> (i32, i32) {
    %c0_i32 = arith.constant 0 : i32
    %c0_i32_0 = arith.constant 0 : i32
    %c0_i32_1 = arith.constant 0 : i32
    return %c0_i32, %c0_i32_0 : i32, i32
  }
  func.func @transform_4(%arg0: i32) -> (i32, i32) {
    %c0_i32 = arith.constant 0 : i32
    %c0_i32_0 = arith.constant 0 : i32
    %c0_i32_1 = arith.constant 0 : i32
    return %c0_i32, %c0_i32_0 : i32, i32
  }
  func.func @transform_5(%arg0: i32) -> (i32, i32) {
    %c0_i32 = arith.constant 0 : i32
    %c0_i32_0 = arith.constant 0 : i32
    return %arg0, %c0_i32 : i32, i32
  }
}

</mosaic_0001>

<bundles_post_ra>
// kernel: tpu_custom_call.1
= control target key start
LH: loop header
LB: loop body
LE: loop exit
PB: predicated region body
PF: predicated region fallthrough
CT: control target
= control target key end

     0   :  { %10 = vsyncpa [#allocation3], 0  ;;  %s1790_s0 = inlined_call_operand.hbm [shape: f32[256,128], index: 0, kind: input, shape index: {}]   ;;  %s1791_s1 = inlined_call_operand.hbm [shape: f32[128,256], index: 1, kind: input, shape index: {}]   ;;  %s1792_s2 = inlined_call_operand.vmem [shape: f32[1,256], index: 2, kind: input, shape index: {}]   ;;  %s1793_s3 = inlined_call_operand.hbm [shape: f32[256,128], index: 3, kind: input, shape index: {}]   ;;  %s1794_s4 = inlined_call_operand.vmem [shape: f32[1,128], index: 4, kind: input, shape index: {}]   ;;  %s1795_s5 = inlined_call_operand.hbm [shape: f32[256,128], index: 5, kind: output, shape index: {}]  }
   0x1   :  { %12 = vsyncpa [#allocation3 + $0x1], 0 }
   0x2   :  { %13 = vsyncpa [#allocation6], 0 }
   0x3   :  { %14 = vsyncpa [#allocation4], 0 }
   0x4   :  { %16 = vsyncpa [#allocation4 + $0x1], 0  ;;  %s1391_s18 = smov 0   ;;  %s1393_s19 = smov 0  }
   0x5   :  { %s1395_s20 = smov 0   ;;  %s1397_s21 = smov 0  }
   0x6 LB: > { %s1412_s22 = sadd.s32 4294967295, %s1348_s21   ;;  %s961_s23 = sadd.s32 4294967294, %s1348_s21   ;;  %s1348_s21 = sphi %s1397_s21, %s1819_s21   ;;  %s1344_s20 = sphi %s1395_s20, %s1818_s20   ;;  %s1340_s19 = sphi %s1393_s19, %s1817_s19   ;;  %s1336_s18 = sphi %s1391_s18, %s1816_s18  }
   0x7   : > { %p42_p0 = scmp.ne.s32.totalorder %s1340_s19, %s1336_s18  ;;  %p1796_p1 = scmp.eq.s32.totalorder %s1412_s22, 0 }
   0x8   : > { %p156_p3 = scmp.eq.s32.totalorder %s961_s23, 1  ;;  %p962_p5 = scmp.ge.s32.totalorder %s1348_s21, 1 }
   0x9   : > { %p1421_p4 = por %p1796_p1, %p42_p0  ;;  %p163_p7 = scmp.lt.s32.totalorder %s1348_s21, 3 }
   0xa   : > { %p1426_p6 = por %p156_p3, %p42_p0  ;;  %s1350_s27 = smov [#allocation5]  }
   0xb   : > { %s1801_s24 = scalar_select %p1421_p4, 1, 0 }
   0xc   : > { %s1802_s25 = scalar_select %p1426_p6, 1, 0 }
   0xd   : > { %p1431_p8 = pnand %p962_p5, %p163_p7  ;;  %s175_s28 = sshll.u32 %s1350_s27, 4  ;;  %s176_s28 = int_to_ptr.vmem [resolvable:$true] %s175_s28 }
   0xe   : > { %s1351_s30 = smov [#allocation7]   ;;  %s1211_s7 = scalar_lea.vmem %s176_s28, 4096 }
   0xf   : > { %s1803_s26 = scalar_select %p1431_p8, 1, 0 }
  0x10   : > { %p1074_p9 = pneg %p1431_p8  ;;  %s191_s6 = sshll.u32 %s1351_s30, 4  ;;  %s192_s6 = int_to_ptr.vmem [resolvable:$true] %s191_s6 }
  0x11   : > { %p1212_p13 = scmp.ne.s32.totalorder %s176_s28, %s1211_s7  ;;  %p1219_p5 = scmp.lt.s32.totalorder %s176_s28, %s176_s28 }
  0x12   : > { %p1440_p11 = pnand %p1074_p9, %p1796_p1  ;;  %p1220_p7 = scmp.lt.s32.totalorder %s1211_s7, %s1211_s7 }
  0x14   : > { %p1202_p12 = pneg %p1440_p11  ;;  %p1221_p10 = por %p1220_p7, %p1219_p5 }
  0x16   : > { %p1214_p0 = pnand %p1212_p13, %p1202_p12 }
  0x18   : > { %p1215_p3 = pneg %p1214_p0 }
  0x1a   : > { %p1222_p9 = pnand %p1221_p10, %p1215_p3 }
  0x1c   : > { %1225 = shalt.err (!%p1222_p9)
}
  0x1d   : > { %s1352_s8 = smov 256   ;;  %s1353_s9 = smov 16  }
  0x1e   : > { %1077 = dma.hbm_to_vmem [thread:$0]  (!%p1440_p11), %s1791_s1, 4096, %s176_s28, [#allocation6], %s1352_s8, %s1352_s8, %s1353_s9  }
  0x1f   : > { %s1237_s12 = scalar_lea.vmem %s192_s6, 4096  ;;  %p1245_p2 = scmp.lt.s32.totalorder %s192_s6, %s192_s6 }
  0x20   : > { %p1238_p1 = scmp.ne.s32.totalorder %s192_s6, %s1237_s12  ;;  %p1246_p6 = scmp.lt.s32.totalorder %s1237_s12, %s1237_s12 }
  0x22   : > { %p1240_p13 = pnand %p1238_p1, %p1202_p12  ;;  %p1247_p5 = por %p1246_p6, %p1245_p2 }
  0x24   : > { %p1241_p0 = pneg %p1240_p13 }
  0x26   : > { %p1248_p10 = pnand %p1247_p5, %p1241_p0 }
  0x28   : > { %1251 = shalt.err (!%p1248_p10)
}
  0x29   : > { %s1797_s13 = smov 128   ;;  %s1355_s14 = smov 8  }
  0x2a   : > { %1080 = dma.hbm_to_vmem [thread:$0]  (!%p1440_p11), %s1793_s3, 4096, %s192_s6, [#allocation6], %s1797_s13, %s1797_s13, %s1355_s14  }
  0x2b   : > { %s1466_s17 = sadd.s32 1, %s1348_s21   ;;  %s29_s27 = sadd.s32 1, %s1344_s20 }
  0x2c   : > { %s26_s23 = ssub.s32 %s1348_s21, %s1466_s17  ;;  %p36_p2 = scmp.ne.s32.totalorder %s1344_s20, %s1340_s19 }
  0x2d   : > { %p27_p1 = scmp.eq.s32.totalorder %s26_s23, 0  ;;  %p37_p6 = scmp.eq.s32.totalorder %s1348_s21, 0 }
  0x2e   : > { %p1805_p3 = scmp.eq.s32.totalorder %s1412_s22, 1  ;;  %p1091_p9 = scmp.lt.s32.totalorder %s1348_s21, 2 }
  0x2f   : > { %s1475_s28 = scalar_select %p27_p1, %s1344_s20, %s29_s27  }
  0x30   : > { %p38_p12 = por %p37_p6, %p36_p2  ;;  %p1479_p7 = por %p1805_p3, %p36_p2 }
  0x31   : > { %s208_s30 = sand.u32 1, %s1344_s20   ;;  %s980_s6 = sshll.u32 %s1348_s21, 11 }
  0x32   : > { %s1806_s29 = scalar_select %p1479_p7, 1, 0 }
  0x33   : > { %s966_s7 = sshll.u32 %s208_s30, 7  ;;  %s1489_s10 = scalar_lea.hbm %s1790_s0, %s980_s6 }
  0x34   : > { %s212_s11 = scalar_lea.vmem [#allocation2], %s966_s7  ;;  %p1493_p11 = pnand %p1091_p9, %p38_p12 }
  0x35   : > { %s219_s12 = sshll.u32 %s212_s11, 4  ;;  %s1497_s16 = scalar_lea.sflag [#allocation3], %s208_s30  ;;  %s1491_s12 = int_to_ptr.vmem [resolvable:$true] %s219_s12 }
  0x36   : > { %s1252_s23 = scalar_lea.hbm %s1489_s10, 2048  ;;  %p1254_p0 = pneg %p1493_p11 }
  0x37   : > { %p1253_p13 = scmp.ne.s32.totalorder %s1489_s10, %s1252_s23  ;;  %s1257_s7 = scalar_lea.hbm %s1790_s0, 4096 }
  0x38   : > { %p1258_p1 = scmp.lt.s32.totalorder %s1489_s10, %s1790_s0  ;;  %p1259_p2 = scmp.lt.s32.totalorder %s1257_s7, %s1252_s23 }
  0x39   : > { %p1255_p5 = pnand %p1254_p0, %p1253_p13 }
  0x3a   : > { %p1260_p6 = por %p1259_p2, %p1258_p1 }
  0x3b   : > { %p1256_p10 = pneg %p1255_p5 }
  0x3d   : > { %p1261_p12 = pnand %p1260_p6, %p1256_p10 }
  0x3f   : > { %1264 = shalt.err (!%p1261_p12)
}
  0x40   : > { %s1265_s30 = scalar_lea.vmem %s1491_s12, 2048  ;;  %s1356_s11 = smov [#allocation2]  }
  0x41   : > { %p1266_p3 = scmp.ne.s32.totalorder %s1491_s12, %s1265_s30  ;;  %s1270_s13 = sshll.u32 %s1356_s11, 4  ;;  %s1271_s13 = int_to_ptr.vmem [resolvable:$false] %s1270_s13 }
  0x42   : > { %s1272_s27 = scalar_lea.vmem %s1271_s13, 4096  ;;  %p1273_p5 = scmp.lt.s32.totalorder %s1491_s12, %s1271_s13 }
  0x43   : > { %p1268_p9 = pnand %p1266_p3, %p1254_p0  ;;  %p1274_p7 = scmp.lt.s32.totalorder %s1272_s27, %s1265_s30 }
  0x45   : > { %p1269_p13 = pneg %p1268_p9  ;;  %p1275_p4 = por %p1274_p7, %p1273_p5 }
  0x47   : > { %p1276_p8 = pnand %p1275_p4, %p1269_p13 }
  0x49   : > { %1279 = shalt.err (!%p1276_p8)
}
  0x4a   : > { %s1808_s23 = smov 128   ;;  %p1809_p0 = scmp.ne.s32.totalorder %s1803_s26, 0 }
  0x4b   : > { %1084 = dma.hbm_to_vmem [thread:$0]  (!%p1493_p11), %s1489_s10, 2048, %s1491_s12, %s1497_s16, %s1808_s23, %s1808_s23, %s1355_s14  }
  0x4c   : > { %231 = sbr.rel (%p1809_p0) target bundleno = 609 (0x261), region = 40  ;;  %s1524_s6 = sand.u32 (!%p1809_p0), 1, %s1340_s19  }
  0x4d   : > { %s970_s13 = sshll.u32 (!%p1809_p0), %s1524_s6, 7  ;;  %s234_s7 = scalar_lea.sflag (!%p1809_p0), [#allocation3], %s1524_s6 }
  0x4e   : > { %s1530_s15 = scalar_lea.vmem (!%p1809_p0), [#allocation2], %s970_s13  ;;  %p1810_p4 = scmp.ne.s32.totalorder (!%p1809_p0), %s1801_s24, 0 }
  0x51   : > { %1323 = dma.done.wait (%p1810_p4), %s234_s7, 2048  }
  0x52   : > { %1325 = vsyncadd (%p1810_p4), %s234_s7, 4294965248  ;;  %p1811_p8 = scmp.eq.s32.totalorder %s1412_s22, 0 }
  0x54   : > { %1327 = dma.done.wait (%p1811_p8), [#allocation6], 8192   ;;  %p1812_p7 = pmov %p1811_p8 }
  0x55   : > { %v1357_v0 = vmov 0.0   ;;  %v321_v1 = vld [vmem:[#allocation5 + $0xf8] sm:$0xff]  ;;  %v320_v2 = vld [vmem:[#allocation5 + $0xf0] sm:$0xff]  ;;  %v319_v3 = vld [vmem:[#allocation5 + $0xe8] sm:$0xff]  ;;  %s1707_s12 = scalar_lea.vmem [#allocation8], %s970_s13  ;;  %s981_s16 = sshll.u32 %s1412_s22, 11 }
  0x56   : > { %1329 = vsyncadd (%p1812_p7), [#allocation6], 4294959104  ;;  %398 = vmatprep.mubr.f32.mxu0 %v1357_v0  ;;  %334 = vmatprep.subr.mxu0 %v321_v1  ;;  %v318_v4 = vld [vmem:[#allocation5 + $0xe0] sm:$0xff]  ;;  %v317_v5 = vld [vmem:[#allocation5 + $0xd8] sm:$0xff]  ;;  %s869_s8 = sshll.u32 %s1707_s12, 4  ;;  %s1743_s11 = scalar_lea.hbm %s1795_s5, %s981_s16  ;;  %s1745_s8 = int_to_ptr.vmem [resolvable:$true] %s869_s8 }
  0x57   : > { %335 = vmatpush1.msra.mxu0 %v320_v2  ;;  %v316_v6 = vld [vmem:[#allocation5 + $0xd0] sm:$0xff]  ;;  %v315_v7 = vld [vmem:[#allocation5 + $0xc8] sm:$0xff]  ;;  %v314_v8 = vld [vmem:[#allocation5 + $0xc0] sm:$0xff]  ;;  %s856_s27 = scalar_lea.sflag [#allocation4], %s1524_s6  ;;  %s1280_s23 = scalar_lea.vmem %s1745_s8, 2048 }
  0x58   : > { %336 = vmatprep.subr.mxu0 %v319_v3  ;;  %v313_v9 = vld [vmem:[#allocation5 + $0xb8] sm:$0xff]  ;;  %v312_v10 = vld [vmem:[#allocation5 + $0xb0] sm:$0xff]  ;;  %v311_v11 = vld [vmem:[#allocation5 + $0xa8] sm:$0xff]  ;;  %p1281_p11 = scmp.ne.s32.totalorder %s1745_s8, %s1280_s23  ;;  %p1813_p10 = scmp.ne.s32.totalorder %s1806_s29, 0 }
  0x59   : > { %337 = vmatpush1.msra.mxu0 %v318_v4  ;;  %v310_v12 = vld [vmem:[#allocation5 + $0xa0] sm:$0xff]  ;;  %v309_v13 = vld [vmem:[#allocation5 + $0x98] sm:$0xff]  ;;  %v308_v14 = vld [vmem:[#allocation5 + $0x90] sm:$0xff]  ;;  %s1358_s22 = smov [#allocation8]  }
  0x5a   : > { %338 = vmatprep.subr.mxu0 %v317_v5  ;;  %v307_v15 = vld [vmem:[#allocation5 + $0x88] sm:$0xff]  ;;  %v306_v16 = vld [vmem:[#allocation5 + $0x80] sm:$0xff]  ;;  %v305_v17 = vld [vmem:[#allocation5 + $0x78] sm:$0xff]  ;;  %p1282_p1 = pnand %p1281_p11, %p1813_p10  ;;  %s1284_s13 = sshll.u32 %s1358_s22, 4  ;;  %s1285_s13 = int_to_ptr.vmem [resolvable:$false] %s1284_s13 }
  0x5b   : > { %339 = vmatpush1.msra.mxu0 %v316_v6  ;;  %v304_v18 = vld [vmem:[#allocation5 + $0x70] sm:$0xff]  ;;  %v303_v19 = vld [vmem:[#allocation5 + $0x68] sm:$0xff]  ;;  %v686_v20 = vld [vmem:[#allocation7 + $0xf8] sm:$0xff]  ;;  %s1286_s7 = scalar_lea.vmem %s1285_s13, 4096  ;;  %p1287_p6 = scmp.lt.s32.totalorder %s1745_s8, %s1285_s13 }
  0x5c   : > { %340 = vmatprep.subr.mxu0 %v315_v7  ;;  %v670_v21 = vld [vmem:[#allocation7 + $0x78] sm:$0xff]  ;;  %v685_v22 = vld [vmem:[#allocation7 + $0xf0] sm:$0xff]  ;;  %v302_v23 = vld [vmem:[#allocation5 + $0x60] sm:$0xff]  ;;  %982 = vmatprep.subr.mxu1 %v686_v20  ;;  %p1283_p2 = pneg %p1282_p1  ;;  %p1288_p12 = scmp.lt.s32.totalorder %s1286_s7, %s1280_s23 }
  0x5d   : > { %341 = vmatpush1.msra.mxu0 %v314_v8  ;;  %v669_v24 = vld [vmem:[#allocation7 + $0x70] sm:$0xff]  ;;  %v301_v25 = vld [vmem:[#allocation5 + $0x58] sm:$0xff]  ;;  %983 = vmatpush3.msra.mxu1 %v670_v21  ;;  %v684_v26 = vld [vmem:[#allocation7 + $0xe8] sm:$0xff] }
  0x5e   : > { %342 = vmatprep.subr.mxu0 %v313_v9  ;;  %v300_v27 = vld [vmem:[#allocation5 + $0x50] sm:$0xff]  ;;  %984 = vmatprep.subr.mxu1 %v685_v22  ;;  %v668_v28 = vld [vmem:[#allocation7 + $0x68] sm:$0xff]  ;;  %v298_v30 = vld [vmem:[#allocation5 + $0x40] sm:$0xff]  ;;  %p1289_p3 = por %p1288_p12, %p1287_p6 }
  0x5f   : > { %343 = vmatpush1.msra.mxu0 %v312_v10  ;;  %v299_v29 = vld [vmem:[#allocation5 + $0x48] sm:$0xff]  ;;  %985 = vmatpush3.msra.mxu1 %v669_v24  ;;  %v297_v31 = vld [vmem:[#allocation5 + $0x38] sm:$0xff]  ;;  %v296_v32 = vld [vmem:[#allocation5 + $0x30] sm:$0xff] }
  0x60   : > { %344 = vmatprep.subr.mxu0 %v311_v11  ;;  %986 = vmatprep.subr.mxu1 %v684_v26  ;;  %v295_v33 = vld [vmem:[#allocation5 + $0x28] sm:$0xff]  ;;  %v294_v34 = vld [vmem:[#allocation5 + $0x20] sm:$0xff]  ;;  %v293_v35 = vld [vmem:[#allocation5 + $0x18] sm:$0xff]  ;;  %p1290_p9 = pnand %p1289_p3, %p1283_p2 }
  0x61   : > { %345 = vmatpush1.msra.mxu0 %v310_v12  ;;  %987 = vmatpush3.msra.mxu1 %v668_v28  ;;  %v292_v36 = vld [vmem:[#allocation5 + $0x10] sm:$0xff]  ;;  %v291_v37 = vld [vmem:[#allocation5 + $0x8] sm:$0xff]  ;;  %v290_v38 = vld [vmem:[#allocation5] sm:$0xff] }
  0x62   : > { %346 = vmatprep.subr.mxu0 %v309_v13  ;;  %v274_v39 = vld [vmem:[%s1530_s15] sm:$0xff]  ;;  %v275_v40 = vld [vmem:[%s1530_s15 + $0x8] sm:$0xff]  ;;  %v276_v41 = vld [vmem:[%s1530_s15 + $0x10] sm:$0xff] }
  0x63   : > { %347 = vmatpush1.msra.mxu0 %v308_v14  ;;  %v277_v42 = vld [vmem:[%s1530_s15 + $0x18] sm:$0xff]  ;;  %v278_v43 = vld [vmem:[%s1530_s15 + $0x20] sm:$0xff]  ;;  %v279_v44 = vld [vmem:[%s1530_s15 + $0x28] sm:$0xff] }
  0x64   : > { %348 = vmatprep.subr.mxu0 %v307_v15  ;;  %v280_v45 = vld [vmem:[%s1530_s15 + $0x30] sm:$0xff]  ;;  %v281_v46 = vld [vmem:[%s1530_s15 + $0x38] sm:$0xff]  ;;  %v282_v47 = vld [vmem:[%s1530_s15 + $0x40] sm:$0xff] }
  0x65   : > { %349 = vmatpush1.msra.mxu0 %v306_v16  ;;  %v283_v48 = vld [vmem:[%s1530_s15 + $0x48] sm:$0xff]  ;;  %v284_v49 = vld [vmem:[%s1530_s15 + $0x50] sm:$0xff]  ;;  %v285_v50 = vld [vmem:[%s1530_s15 + $0x58] sm:$0xff] }
  0x66   : > { %350 = vmatprep.subr.mxu0 %v305_v17  ;;  %v286_v51 = vld [vmem:[%s1530_s15 + $0x60] sm:$0xff]  ;;  %v287_v52 = vld [vmem:[%s1530_s15 + $0x68] sm:$0xff]  ;;  %v288_v53 = vld [vmem:[%s1530_s15 + $0x70] sm:$0xff]  ;;  %v324_v17 = vlaneseq }
  0x67   : > { %351 = vmatpush1.msra.mxu0 %v304_v18  ;;  %v289_v54 = vld [vmem:[%s1530_s15 + $0x78] sm:$0xff]  ;;  %v683_v55 = vld [vmem:[#allocation7 + $0xe0] sm:$0xff]  ;;  %v681_v59 = vld [vmem:[#allocation7 + $0xd0] sm:$0xff] }
  0x68   : > { %352 = vmatprep.subr.mxu0 %v303_v19  ;;  %988 = vmatprep.subr.mxu1 %v683_v55  ;;  %v667_v56 = vld [vmem:[#allocation7 + $0x60] sm:$0xff]  ;;  %v682_v57 = vld [vmem:[#allocation7 + $0xd8] sm:$0xff]  ;;  %v665_v60 = vld [vmem:[#allocation7 + $0x50] sm:$0xff]  ;;  %v325_v18 = vshrl.u32 %v324_v17, 7 }
  0x69   : > { %353 = vmatpush1.msra.mxu0 %v302_v23  ;;  %989 = vmatpush3.msra.mxu1 %v667_v56  ;;  %v666_v58 = vld [vmem:[#allocation7 + $0x58] sm:$0xff]  ;;  %v680_v61 = vld [vmem:[#allocation7 + $0xc8] sm:$0xff]  ;;  %v679_v63 = vld [vmem:[#allocation7 + $0xc0] sm:$0xff] }
  0x6a   : > { %354 = vmatprep.subr.mxu0 %v301_v25  ;;  %990 = vmatprep.subr.mxu1 %v682_v57  ;;  %v664_v62 = vld [vmem:[#allocation7 + $0x48] sm:$0xff]  ;;  %v678_v1 = vld [vmem:[#allocation7 + $0xb8] sm:$0xff]  ;;  %v677_v3 = vld [vmem:[#allocation7 + $0xb0] sm:$0xff]  ;;  %v326_v19 = vsub.s32 0, %v325_v18  ;;  %v330_v21 = vsub.s32 1, %v325_v18 }
  0x6b   : > { %355 = vmatpush1.msra.mxu0 %v300_v27  ;;  %991 = vmatpush3.msra.mxu1 %v666_v58  ;;  %v662_v2 = vld [vmem:[#allocation7 + $0x38] sm:$0xff]  ;;  %v661_v4 = vld [vmem:[#allocation7 + $0x30] sm:$0xff]  ;;  %v676_v5 = vld [vmem:[#allocation7 + $0xa8] sm:$0xff] }
  0x6c   : > { %356 = vmatprep.subr.mxu0 %v299_v29  ;;  %992 = vmatprep.subr.mxu1 %v681_v59  ;;  %v660_v6 = vld [vmem:[#allocation7 + $0x28] sm:$0xff]  ;;  %v675_v7 = vld [vmem:[#allocation7 + $0xa0] sm:$0xff]  ;;  %v674_v9 = vld [vmem:[#allocation7 + $0x98] sm:$0xff] }
  0x6d   : > { %357 = vmatpush1.msra.mxu0 %v298_v30  ;;  %993 = vmatpush3.msra.mxu1 %v665_v60  ;;  %v659_v8 = vld [vmem:[#allocation7 + $0x20] sm:$0xff]  ;;  %v658_v10 = vld [vmem:[#allocation7 + $0x18] sm:$0xff]  ;;  %v673_v11 = vld [vmem:[#allocation7 + $0x90] sm:$0xff] }
  0x6e   : > { %358 = vmatprep.subr.mxu0 %v297_v31  ;;  %994 = vmatprep.subr.mxu1 %v680_v61  ;;  %v657_v12 = vld [vmem:[#allocation7 + $0x10] sm:$0xff]  ;;  %v672_v13 = vld [vmem:[#allocation7 + $0x88] sm:$0xff]  ;;  %v671_v15 = vld [vmem:[#allocation7 + $0x80] sm:$0xff] }
  0x6f   : > { %359 = vmatpush1.msra.mxu0 %v296_v32  ;;  %995 = vmatpush3.msra.mxu1 %v664_v62  ;;  %v656_v14 = vld [vmem:[#allocation7 + $0x8] sm:$0xff]  ;;  %v655_v16 = vld [vmem:[#allocation7] sm:$0xff] }
  0x70   : > { %360 = vmatprep.subr.mxu0 %v295_v33  ;;  %996 = vmatprep.subr.mxu1 %v679_v63  ;;  %v322_v20 = vld [vmem:[%s1792_s2] sm:$0x3] }
  0x71   : > { %361 = vmatpush1.msra.mxu0 %v294_v34  ;;  %v1575_v22 = vrot.slane %v322_v20, %v326_v19  ;;  %v1577_v23 = vrot.slane %v322_v20, %v330_v21 }
  0x72   : > { %362 = vmatprep.subr.mxu0 %v293_v35 }
  0x73   : > { %363 = vmatpush1.msra.mxu0 %v292_v36 }
  0x74   : > { %364 = vmatprep.subr.mxu0 %v291_v37 }
  0x75   : > { %365 = vmatpush1.msra.mxu0 %v290_v38 }
  0x76   : > { %399 = vmatmul.mubr.f32.vlgmr.msra.gmra.mxu0 %v274_v39 }
  0x77   : > { %404 = vmatprep.mubr.f32.mxu0 %v1357_v0 }
  0x7a   : > { %405 = vmatmul.mubr.f32.gmra.mxu0 %v275_v40 }
  0x7b   : > { %410 = vmatprep.mubr.f32.mxu0 %v1357_v0 }
  0x7e   : > { %411 = vmatmul.mubr.f32.gmra.mxu0 %v276_v41 }
  0x7f   : > { %416 = vmatprep.mubr.f32.mxu0 %v1357_v0 }
  0x82   : > { %417 = vmatmul.mubr.f32.gmra.mxu0 %v277_v42 }
  0x83   : > { %422 = vmatprep.mubr.f32.mxu0 %v1357_v0 }
  0x86   : > { %423 = vmatmul.mubr.f32.gmra.mxu0 %v278_v43 }
  0x87   : > { %428 = vmatprep.mubr.f32.mxu0 %v1357_v0 }
  0x8a   : > { %429 = vmatmul.mubr.f32.gmra.mxu0 %v279_v44 }
  0x8b   : > { %434 = vmatprep.mubr.f32.mxu0 %v1357_v0 }
  0x8e   : > { %435 = vmatmul.mubr.f32.gmra.mxu0 %v280_v45 }
  0x8f   : > { %440 = vmatprep.mubr.f32.mxu0 %v1357_v0 }
  0x92   : > { %441 = vmatmul.mubr.f32.gmra.mxu0 %v281_v46 }
  0x93   : > { %446 = vmatprep.mubr.f32.mxu0 %v1357_v0 }
  0x96   : > { %447 = vmatmul.mubr.f32.gmra.mxu0 %v282_v47 }
  0x97   : > { %452 = vmatprep.mubr.f32.mxu0 %v1357_v0 }
  0x9a   : > { %453 = vmatmul.mubr.f32.gmra.mxu0 %v283_v48 }
  0x9b   : > { %458 = vmatprep.mubr.f32.mxu0 %v1357_v0 }
  0x9e   : > { %459 = vmatmul.mubr.f32.gmra.mxu0 %v284_v49 }
  0x9f   : > { %464 = vmatprep.mubr.f32.mxu0 %v1357_v0 }
  0xa2   : > { %465 = vmatmul.mubr.f32.gmra.mxu0 %v285_v50 }
  0xa3   : > { %470 = vmatprep.mubr.f32.mxu0 %v1357_v0 }
  0xa6   : > { %471 = vmatmul.mubr.f32.gmra.mxu0 %v286_v51 }
  0xa7   : > { %476 = vmatprep.mubr.f32.mxu0 %v1357_v0 }
  0xaa   : > { %477 = vmatmul.mubr.f32.gmra.mxu0 %v287_v52 }
  0xab   : > { %482 = vmatprep.mubr.f32.mxu0 %v1357_v0 }
  0xae   : > { %483 = vmatmul.mubr.f32.gmra.mxu0 %v288_v53 }
  0xaf   : > { %488 = vmatprep.mubr.f32.mxu0 %v1357_v0  ;;  %v663_v0 = vld [vmem:[#allocation7 + $0x40] sm:$0xff] }
  0xb0   : > { %997 = vmatpush3.msra.mxu1 %v663_v0 }
  0xb1   : > { %998 = vmatprep.subr.mxu1 %v678_v1 }
  0xb2   : > { %489 = vmatmul.mubr.f32.gmra.mxu0 %v289_v54  ;;  %999 = vmatpush3.msra.mxu1 %v662_v2 }
  0xb3   : > { %1000 = vmatprep.subr.mxu1 %v677_v3 }
  0xb4   : > { %1001 = vmatpush3.msra.mxu1 %v661_v4 }
  0xb5   : > { %1002 = vmatprep.subr.mxu1 %v676_v5 }
  0xb6   : > { %1003 = vmatpush3.msra.mxu1 %v660_v6 }
  0xb7   : > { %1004 = vmatprep.subr.mxu1 %v675_v7 }
  0xb8   : > { %1005 = vmatpush3.msra.mxu1 %v659_v8 }
  0xb9   : > { %1006 = vmatprep.subr.mxu1 %v674_v9 }
  0xba   : > { %1007 = vmatpush3.msra.mxu1 %v658_v10 }
  0xbb   : > { %1008 = vmatprep.subr.mxu1 %v673_v11 }
  0xbc   : > { %1009 = vmatpush3.msra.mxu1 %v657_v12 }
  0xbd   : > { %1010 = vmatprep.subr.mxu1 %v672_v13 }
  0xbe   : > { %1011 = vmatpush3.msra.mxu1 %v656_v14 }
  0xbf   : > { %1012 = vmatprep.subr.mxu1 %v671_v15 }
  0xc0   : > { %1013 = vmatpush3.msra.mxu1 %v655_v16 }
 0x136   : > { %v400_v24 = vpop.f32.mrf.mxu0 }
 0x137   : > { %v401_v25 = vadd.f32 %v400_v24, %v1575_v22 }
 0x138   : > { %v402_v26 = vpop.f32.mrf.mxu0 }
 0x139   : > { %v527_v27 = vmul.f32 0.70710677, %v401_v25  ;;  %v403_v28 = vadd.f32 %v402_v26, %v1577_v23  ;;  %v495_v60 = vmul.f32 0.5, %v401_v25 }
 0x13a   : > { %v406_v29 = vpop.f32.mrf.mxu0 }
 0x13b   : > { %1136 = verf.f32 %v527_v27  ;;  %v528_v30 = vmul.f32 0.70710677, %v403_v28  ;;  %v407_v31 = vadd.f32 %v406_v29, %v1575_v22  ;;  %v496_v62 = vmul.f32 0.5, %v403_v28 }
 0x13c   : > { %v408_v32 = vpop.f32.mrf.mxu0 }
 0x13d   : > { %1138 = verf.f32 %v528_v30  ;;  %v529_v33 = vmul.f32 0.70710677, %v407_v31  ;;  %v409_v34 = vadd.f32 %v408_v32, %v1577_v23  ;;  %v497_v13 = vmul.f32 0.5, %v407_v31 }
 0x13e   : > { %v412_v35 = vpop.f32.mrf.mxu0 }
 0x13f   : > { %1140 = verf.f32 %v529_v33  ;;  %v530_v36 = vmul.f32 0.70710677, %v409_v34  ;;  %v413_v37 = vadd.f32 %v412_v35, %v1575_v22  ;;  %v498_v10 = vmul.f32 0.5, %v409_v34 }
 0x140   : > { %v414_v38 = vpop.f32.mrf.mxu0 }
 0x141   : > { %1142 = verf.f32 %v530_v36  ;;  %v531_v39 = vmul.f32 0.70710677, %v413_v37  ;;  %v415_v40 = vadd.f32 %v414_v38, %v1577_v23  ;;  %v499_v26 = vmul.f32 0.5, %v413_v37 }
 0x142   : > { %v418_v41 = vpop.f32.mrf.mxu0 }
 0x143   : > { %1144 = verf.f32 %v531_v39  ;;  %v532_v42 = vmul.f32 0.70710677, %v415_v40  ;;  %v1586_v43 = vadd.f32 %v418_v41, %v1575_v22  ;;  %v500_v27 = vmul.f32 0.5, %v415_v40 }
 0x144   : > { %v420_v44 = vpop.f32.mrf.mxu0 }
 0x145   : > { %1146 = verf.f32 %v532_v42  ;;  %v533_v45 = vmul.f32 0.70710677, %v1586_v43  ;;  %v1590_v46 = vadd.f32 %v420_v44, %v1577_v23  ;;  %v501_v44 = vmul.f32 0.5, %v1586_v43 }
 0x146   : > { %v424_v47 = vpop.f32.mrf.mxu0 }
 0x147   : > { %1148 = verf.f32 %v533_v45  ;;  %v534_v48 = vmul.f32 0.70710677, %v1590_v46  ;;  %v1594_v49 = vadd.f32 %v424_v47, %v1575_v22  ;;  %v502_v40 = vmul.f32 0.5, %v1590_v46 }
 0x148   : > { %v1137_v50 = vpop.eup %1136  ;;  %v426_v51 = vpop.f32.mrf.mxu0 }
 0x149   : > { %1150 = verf.f32 %v534_v48  ;;  %v535_v52 = vmul.f32 0.70710677, %v1594_v49  ;;  %v1598_v53 = vadd.f32 %v426_v51, %v1577_v23  ;;  %v591_v56 = vadd.f32 1.0, %v1137_v50 }
 0x14a   : > { %v1139_v54 = vpop.eup %1138  ;;  %v430_v55 = vpop.f32.mrf.mxu0  ;;  %v503_v43 = vmul.f32 0.5, %v1594_v49 }
 0x14b   : > { %1152 = verf.f32 %v535_v52  ;;  %v536_v57 = vmul.f32 0.70710677, %v1598_v53  ;;  %v1602_v58 = vadd.f32 %v430_v55, %v1575_v22  ;;  %v592_v63 = vadd.f32 1.0, %v1139_v54 }
 0x14c   : > { %v1141_v59 = vpop.eup %1140  ;;  %v432_v61 = vpop.f32.mrf.mxu0  ;;  %v623_v5 = vmul.f32 %v591_v56, %v495_v60 }
 0x14d   : > { %1154 = verf.f32 %v536_v57  ;;  %v537_v0 = vmul.f32 0.70710677, %v1602_v58  ;;  %v1606_v1 = vadd.f32 %v432_v61, %v1577_v23  ;;  %v624_v4 = vmul.f32 %v592_v63, %v496_v62 }
 0x14e   : > { %v1143_v2 = vpop.eup %1142  ;;  %v436_v3 = vpop.f32.mrf.mxu0  ;;  %v593_v8 = vadd.f32 1.0, %v1141_v59  ;;  %v504_v57 = vmul.f32 0.5, %v1598_v53 }
 0x14f   : > { %1156 = verf.f32 %v537_v0  ;;  %v538_v6 = vmul.f32 0.70710677, %v1606_v1  ;;  %v1610_v7 = vadd.f32 %v436_v3, %v1575_v22  ;;  %758 = vmatprep.mubr.f32.mxu1 %v624_v4  ;;  %v594_v12 = vadd.f32 1.0, %v1143_v2 }
 0x150   : > { %v1145_v9 = vpop.eup %1144  ;;  %v438_v11 = vpop.f32.mrf.mxu0  ;;  %759 = vmatmul.mubr.f32.vlgmr.msra.gmra.mxu1 %v623_v5  ;;  %v625_v24 = vmul.f32 %v593_v8, %v497_v13 }
 0x151   : > { %1158 = verf.f32 %v538_v6  ;;  %v539_v14 = vmul.f32 0.70710677, %v1610_v7  ;;  %v1614_v15 = vadd.f32 %v438_v11, %v1577_v23  ;;  %v626_v18 = vmul.f32 %v594_v12, %v498_v10 }
 0x152   : > { %v1147_v16 = vpop.eup %1146  ;;  %v442_v17 = vpop.f32.mrf.mxu0  ;;  %v595_v19 = vadd.f32 1.0, %v1145_v9  ;;  %v506_v6 = vmul.f32 0.5, %v1606_v1  ;;  %v505_v10 = vmul.f32 0.5, %v1602_v58  ;;  %v507_v58 = vmul.f32 0.5, %v1610_v7 }
 0x153   : > { %1160 = verf.f32 %v539_v14  ;;  %v540_v20 = vmul.f32 0.70710677, %v1614_v15  ;;  %v1618_v21 = vadd.f32 %v442_v17, %v1575_v22  ;;  %763 = vmatprep.mubr.f32.mxu1 %v626_v18  ;;  %v596_v29 = vadd.f32 1.0, %v1147_v16 }
 0x154   : > { %v1149_v25 = vpop.eup %1148  ;;  %v444_v28 = vpop.f32.mrf.mxu0  ;;  %764 = vmatmul.mubr.f32.gmra.mxu1 %v625_v24  ;;  %v627_v35 = vmul.f32 %v595_v19, %v499_v26  ;;  %v508_v24 = vmul.f32 0.5, %v1614_v15 }
 0x155   : > { %1162 = verf.f32 %v540_v20  ;;  %v541_v30 = vmul.f32 0.70710677, %v1618_v21  ;;  %v1622_v31 = vadd.f32 %v444_v28, %v1577_v23  ;;  %v628_v34 = vmul.f32 %v596_v29, %v500_v27 }
 0x156   : > { %v1151_v32 = vpop.eup %1150  ;;  %v448_v33 = vpop.f32.mrf.mxu0  ;;  %v597_v38 = vadd.f32 1.0, %v1149_v25 }
 0x157   : > { %1164 = verf.f32 %v541_v30  ;;  %v542_v36 = vmul.f32 0.70710677, %v1622_v31  ;;  %v1626_v37 = vadd.f32 %v448_v33, %v1575_v22  ;;  %768 = vmatprep.mubr.f32.mxu1 %v628_v34  ;;  %v598_v42 = vadd.f32 1.0, %v1151_v32 }
 0x158   : > { %v1153_v39 = vpop.eup %1152  ;;  %v450_v41 = vpop.f32.mrf.mxu0  ;;  %769 = vmatmul.mubr.f32.gmra.mxu1 %v627_v35  ;;  %v629_v55 = vmul.f32 %v597_v38, %v501_v44 }
 0x159   : > { %1166 = verf.f32 %v542_v36  ;;  %v543_v45 = vmul.f32 0.70710677, %v1626_v37  ;;  %v1632_v47 = vadd.f32 %v450_v41, %v1577_v23  ;;  %v630_v51 = vmul.f32 %v598_v42, %v502_v40 }
 0x15a   : > { %v1155_v48 = vpop.eup %1154  ;;  %v454_v50 = vpop.f32.mrf.mxu0  ;;  %v599_v52 = vadd.f32 1.0, %v1153_v39  ;;  %v510_v36 = vmul.f32 0.5, %v1622_v31  ;;  %v509_v40 = vmul.f32 0.5, %v1618_v21  ;;  %v511_v21 = vmul.f32 0.5, %v1626_v37 }
 0x15b   : > { %1168 = verf.f32 %v543_v45  ;;  %v544_v54 = vmul.f32 0.70710677, %v1632_v47  ;;  %v1636_v46 = vadd.f32 %v454_v50, %v1575_v22  ;;  %773 = vmatprep.mubr.f32.mxu1 %v630_v51  ;;  %v600_v60 = vadd.f32 1.0, %v1155_v48 }
 0x15c   : > { %v1157_v56 = vpop.eup %1156  ;;  %v456_v59 = vpop.f32.mrf.mxu0  ;;  %774 = vmatmul.mubr.f32.gmra.mxu1 %v629_v55  ;;  %v631_v3 = vmul.f32 %v599_v52, %v503_v43  ;;  %v512_v55 = vmul.f32 0.5, %v1632_v47 }
 0x15d   : > { %1170 = verf.f32 %v544_v54  ;;  %v545_v61 = vmul.f32 0.70710677, %v1636_v46  ;;  %v1642_v62 = vadd.f32 %v456_v59, %v1577_v23  ;;  %v632_v2 = vmul.f32 %v600_v60, %v504_v57 }
 0x15e   : > { %v1159_v63 = vpop.eup %1158  ;;  %v460_v0 = vpop.f32.mrf.mxu0  ;;  %v601_v53 = vadd.f32 1.0, %v1157_v56 }
 0x15f   : > { %1172 = verf.f32 %v545_v61  ;;  %v546_v4 = vmul.f32 0.70710677, %v1642_v62  ;;  %v1646_v49 = vadd.f32 %v460_v0, %v1575_v22  ;;  %778 = vmatprep.mubr.f32.mxu1 %v632_v2  ;;  %v602_v9 = vadd.f32 1.0, %v1159_v63 }
 0x160   : > { %v1161_v5 = vpop.eup %1160  ;;  %v462_v8 = vpop.f32.mrf.mxu0  ;;  %779 = vmatmul.mubr.f32.gmra.mxu1 %v631_v3  ;;  %v633_v19 = vmul.f32 %v601_v53, %v505_v10 }
 0x161   : > { %1174 = verf.f32 %v546_v4  ;;  %v547_v11 = vmul.f32 0.70710677, %v1646_v49  ;;  %v1652_v12 = vadd.f32 %v462_v8, %v1577_v23  ;;  %v634_v16 = vmul.f32 %v602_v9, %v506_v6 }
 0x162   : > { %v1163_v13 = vpop.eup %1162  ;;  %v466_v14 = vpop.f32.mrf.mxu0  ;;  %v603_v17 = vadd.f32 1.0, %v1161_v5  ;;  %v514_v4 = vmul.f32 0.5, %v1642_v62  ;;  %v513_v6 = vmul.f32 0.5, %v1636_v46 }
 0x163   : > { %1176 = verf.f32 %v547_v11  ;;  %v548_v18 = vmul.f32 0.70710677, %v1652_v12  ;;  %v1656_v1 = vadd.f32 %v466_v14, %v1575_v22  ;;  %783 = vmatprep.mubr.f32.mxu1 %v634_v16  ;;  %v604_v26 = vadd.f32 1.0, %v1163_v13 }
 0x164   : > { %v1165_v20 = vpop.eup %1164  ;;  %v468_v25 = vpop.f32.mrf.mxu0  ;;  %784 = vmatmul.mubr.f32.gmra.mxu1 %v633_v19  ;;  %v635_v33 = vmul.f32 %v603_v17, %v507_v58  ;;  %v515_v19 = vmul.f32 0.5, %v1646_v49  ;;  %v516_v46 = vmul.f32 0.5, %v1652_v12 }
 0x165   : > { %1178 = verf.f32 %v548_v18  ;;  %v549_v27 = vmul.f32 0.70710677, %v1656_v1  ;;  %v1662_v28 = vadd.f32 %v468_v25, %v1577_v23  ;;  %v636_v32 = vmul.f32 %v604_v26, %v508_v24 }
 0x166   : > { %v1167_v29 = vpop.eup %1166  ;;  %v472_v30 = vpop.f32.mrf.mxu0  ;;  %v605_v15 = vadd.f32 1.0, %v1165_v20  ;;  %v517_v12 = vmul.f32 0.5, %v1656_v1 }
 0x167   : > { %1180 = verf.f32 %v549_v27  ;;  %v550_v34 = vmul.f32 0.70710677, %v1662_v28  ;;  %v1666_v7 = vadd.f32 %v472_v30, %v1575_v22  ;;  %788 = vmatprep.mubr.f32.mxu1 %v636_v32  ;;  %v606_v39 = vadd.f32 1.0, %v1167_v29 }
 0x168   : > { %v1169_v35 = vpop.eup %1168  ;;  %v474_v38 = vpop.f32.mrf.mxu0  ;;  %789 = vmatmul.mubr.f32.gmra.mxu1 %v635_v33  ;;  %v637_v52 = vmul.f32 %v605_v15, %v509_v40  ;;  %v518_v27 = vmul.f32 0.5, %v1662_v28 }
 0x169   : > { %1182 = verf.f32 %v550_v34  ;;  %v551_v41 = vmul.f32 0.70710677, %v1666_v7  ;;  %v1672_v42 = vadd.f32 %v474_v38, %v1577_v23  ;;  %v638_v48 = vmul.f32 %v606_v39, %v510_v36 }
 0x16a   : > { %v1171_v44 = vpop.eup %1170  ;;  %v478_v45 = vpop.f32.mrf.mxu0  ;;  %v607_v50 = vadd.f32 1.0, %v1169_v35  ;;  %v519_v39 = vmul.f32 0.5, %v1666_v7 }
 0x16b   : > { %1184 = verf.f32 %v551_v41  ;;  %v552_v51 = vmul.f32 0.70710677, %v1672_v42  ;;  %v1676_v31 = vadd.f32 %v478_v45, %v1575_v22  ;;  %793 = vmatprep.mubr.f32.mxu1 %v638_v48  ;;  %v608_v43 = vadd.f32 1.0, %v1171_v44 }
 0x16c   : > { %v1173_v54 = vpop.eup %1172  ;;  %v480_v56 = vpop.f32.mrf.mxu0  ;;  %794 = vmatmul.mubr.f32.gmra.mxu1 %v637_v52  ;;  %v639_v0 = vmul.f32 %v607_v50, %v511_v21 }
 0x16d   : > { %1186 = verf.f32 %v552_v51  ;;  %v553_v57 = vmul.f32 0.70710677, %v1676_v31  ;;  %v481_v59 = vadd.f32 %v480_v56, %v1577_v23  ;;  %v640_v63 = vmul.f32 %v608_v43, %v512_v55 }
 0x16e   : > { %v1175_v60 = vpop.eup %1174  ;;  %v484_v61 = vpop.f32.mrf.mxu0  ;;  %v609_v37 = vadd.f32 1.0, %v1173_v54  ;;  %v521_v51 = vmul.f32 0.5, %v1676_v31 }
 0x16f   : > { %1188 = verf.f32 %v553_v57  ;;  %v554_v2 = vmul.f32 0.70710677, %v481_v59  ;;  %v1683_v3 = vadd.f32 %v484_v61, %v1575_v22  ;;  %798 = vmatprep.mubr.f32.mxu1 %v640_v63  ;;  %v610_v5 = vadd.f32 1.0, %v1175_v60 }
 0x170   : > { %v1177_v47 = vpop.eup %1176  ;;  %v486_v53 = vpop.f32.mrf.mxu0  ;;  %799 = vmatmul.mubr.f32.gmra.mxu1 %v639_v0  ;;  %v641_v62 = vmul.f32 %v609_v37, %v513_v6  ;;  %v522_v44 = vmul.f32 0.5, %v481_v59 }
 0x171   : > { %1190 = verf.f32 %v554_v2  ;;  %v555_v8 = vmul.f32 0.70710677, %v1683_v3  ;;  %v487_v9 = vadd.f32 %v486_v53, %v1577_v23  ;;  %v642_v13 = vmul.f32 %v610_v5, %v514_v4 }
 0x172   : > { %v1179_v10 = vpop.eup %1178  ;;  %v490_v11 = vpop.f32.mrf.mxu0  ;;  %v611_v14 = vadd.f32 1.0, %v1177_v47  ;;  %v523_v43 = vmul.f32 0.5, %v1683_v3  ;;  %v1702_v3 = vld [vmem:[%s1794_s4] ss:$0 sm:$0xff] }
 0x173   : > { %1192 = verf.f32 %v555_v8  ;;  %v556_v16 = vmul.f32 0.70710677, %v487_v9  ;;  %v491_v17 = vadd.f32 %v490_v11, %v1575_v22  ;;  %803 = vmatprep.mubr.f32.mxu1 %v642_v13  ;;  %v612_v58 = vadd.f32 1.0, %v1179_v10 }
 0x174   : > { %v1181_v18 = vpop.eup %1180  ;;  %v492_v20 = vpop.f32.mrf.mxu0  ;;  %804 = vmatmul.mubr.f32.gmra.mxu1 %v641_v62  ;;  %v643_v30 = vmul.f32 %v611_v14, %v515_v19  ;;  %v524_v54 = vmul.f32 0.5, %v487_v9 }
 0x175   : > { %1194 = verf.f32 %v556_v16  ;;  %v557_v24 = vmul.f32 0.70710677, %v491_v17  ;;  %v493_v25 = vadd.f32 %v492_v20, %v1577_v23  ;;  %v644_v29 = vmul.f32 %v612_v58, %v516_v46 }
 0x176   : > { %v1183_v26 = vpop.eup %1182  ;;  %v613_v33 = vadd.f32 1.0, %v1181_v18  ;;  %v520_v23 = vmul.f32 0.5, %v1672_v42  ;;  %v525_v0 = vmul.f32 0.5, %v491_v17 }
 0x177   : > { %1196 = verf.f32 %v557_v24  ;;  %v558_v22 = vmul.f32 0.70710677, %v493_v25  ;;  %v614_v32 = vadd.f32 1.0, %v1183_v26  ;;  %808 = vmatprep.mubr.f32.mxu1 %v644_v29  ;;  %v526_v60 = vmul.f32 0.5, %v493_v25 }
 0x178   : > { %v1185_v49 = vpop.eup %1184  ;;  %809 = vmatmul.mubr.f32.gmra.mxu1 %v643_v30  ;;  %v645_v35 = vmul.f32 %v613_v33, %v517_v12 }
 0x179   : > { %1198 = verf.f32 %v558_v22  ;;  %v646_v34 = vmul.f32 %v614_v32, %v518_v27  ;;  %v615_v28 = vadd.f32 1.0, %v1185_v49 }
 0x17a   : > { %v1187_v15 = vpop.eup %1186 }
 0x17b   : > { %813 = vmatprep.mubr.f32.mxu1 %v646_v34  ;;  %v616_v36 = vadd.f32 1.0, %v1187_v15  ;;  %v647_v45 = vmul.f32 %v615_v28, %v519_v39 }
 0x17c   : > { %v1189_v38 = vpop.eup %1188  ;;  %814 = vmatmul.mubr.f32.gmra.mxu1 %v645_v35 }
 0x17d   : > { %v648_v40 = vmul.f32 %v616_v36, %v520_v23  ;;  %v617_v48 = vadd.f32 1.0, %v1189_v38 }
 0x17e   : > { %v1191_v41 = vpop.eup %1190 }
 0x17f   : > { %818 = vmatprep.mubr.f32.mxu1 %v648_v40  ;;  %v618_v1 = vadd.f32 1.0, %v1191_v41  ;;  %v649_v21 = vmul.f32 %v617_v48, %v521_v51 }
 0x180   : > { %v1193_v50 = vpop.eup %1192  ;;  %819 = vmatmul.mubr.f32.gmra.mxu1 %v647_v45 }
 0x181   : > { %v650_v42 = vmul.f32 %v618_v1, %v522_v44  ;;  %v619_v56 = vadd.f32 1.0, %v1193_v50 }
 0x182   : > { %v1195_v52 = vpop.eup %1194 }
 0x183   : > { %823 = vmatprep.mubr.f32.mxu1 %v650_v42  ;;  %v620_v55 = vadd.f32 1.0, %v1195_v52  ;;  %v651_v61 = vmul.f32 %v619_v56, %v523_v43 }
 0x184   : > { %v1197_v7 = vpop.eup %1196  ;;  %824 = vmatmul.mubr.f32.gmra.mxu1 %v649_v21 }
 0x185   : > { %v652_v57 = vmul.f32 %v620_v55, %v524_v54  ;;  %v621_v31 = vadd.f32 1.0, %v1197_v7 }
 0x186   : > { %v1199_v59 = vpop.eup %1198 }
 0x187   : > { %828 = vmatprep.mubr.f32.mxu1 %v652_v57  ;;  %v622_v63 = vadd.f32 1.0, %v1199_v59  ;;  %v653_v37 = vmul.f32 %v621_v31, %v525_v0 }
 0x188   : > { %829 = vmatmul.mubr.f32.gmra.mxu1 %v651_v61 }
 0x189   : > { %v654_v2 = vmul.f32 %v622_v63, %v526_v60 }
 0x18b   : > { %833 = vmatprep.mubr.f32.mxu1 %v654_v2 }
 0x18c   : > { %834 = vmatmul.mubr.f32.gmra.mxu1 %v653_v37 }
 0x210   : > { %v1014_v47 = vpop.f32.mrf.mxu1 }
 0x212   : > { %v1015_v4 = vpop.f32.mrf.mxu1 }
 0x213   : > { %v1016_v53 = vadd.f32 %v1015_v4, %v1014_v47 }
 0x214   : > { %v1017_v5 = vpop.f32.mrf.mxu1 }
 0x215   : > { %v761_v6 = vadd.f32 %v1016_v53, %v1702_v3 }
 0x216   : > { %v1018_v8 = vpop.f32.mrf.mxu1 }
 0x217   : > { %839 = vst [vmem:[%s1707_s12] sm:$0xff] %v761_v6  ;;  %v1019_v9 = vadd.f32 %v1018_v8, %v1017_v5 }
 0x218   : > { %v1020_v10 = vpop.f32.mrf.mxu1 }
 0x219   : > { %v766_v11 = vadd.f32 %v1019_v9, %v1702_v3 }
 0x21a   : > { %v1021_v13 = vpop.f32.mrf.mxu1 }
 0x21b   : > { %840 = vst [vmem:[%s1707_s12 + $0x8] sm:$0xff] %v766_v11  ;;  %v1022_v14 = vadd.f32 %v1021_v13, %v1020_v10 }
 0x21c   : > { %v1023_v16 = vpop.f32.mrf.mxu1 }
 0x21d   : > { %v771_v17 = vadd.f32 %v1022_v14, %v1702_v3 }
 0x21e   : > { %v1024_v62 = vpop.f32.mrf.mxu1 }
 0x21f   : > { %841 = vst [vmem:[%s1707_s12 + $0x10] sm:$0xff] %v771_v17  ;;  %v1025_v18 = vadd.f32 %v1024_v62, %v1023_v16 }
 0x220   : > { %v1026_v19 = vpop.f32.mrf.mxu1 }
 0x221   : > { %v776_v46 = vadd.f32 %v1025_v18, %v1702_v3 }
 0x222   : > { %v1027_v20 = vpop.f32.mrf.mxu1 }
 0x223   : > { %842 = vst [vmem:[%s1707_s12 + $0x18] sm:$0xff] %v776_v46  ;;  %v1028_v58 = vadd.f32 %v1027_v20, %v1026_v19 }
 0x224   : > { %v1029_v24 = vpop.f32.mrf.mxu1 }
 0x225   : > { %v781_v25 = vadd.f32 %v1028_v58, %v1702_v3 }
 0x226   : > { %v1030_v26 = vpop.f32.mrf.mxu1 }
 0x227   : > { %843 = vst [vmem:[%s1707_s12 + $0x20] sm:$0xff] %v781_v25  ;;  %v1031_v27 = vadd.f32 %v1030_v26, %v1029_v24 }
 0x228   : > { %v1032_v29 = vpop.f32.mrf.mxu1 }
 0x229   : > { %v786_v30 = vadd.f32 %v1031_v27, %v1702_v3 }
 0x22a   : > { %v1033_v22 = vpop.f32.mrf.mxu1 }
 0x22b   : > { %844 = vst [vmem:[%s1707_s12 + $0x28] sm:$0xff] %v786_v30  ;;  %v1034_v32 = vadd.f32 %v1033_v22, %v1032_v29 }
 0x22c   : > { %v1035_v33 = vpop.f32.mrf.mxu1 }
 0x22d   : > { %v791_v49 = vadd.f32 %v1034_v32, %v1702_v3 }
 0x22e   : > { %v1036_v12 = vpop.f32.mrf.mxu1 }
 0x22f   : > { %845 = vst [vmem:[%s1707_s12 + $0x30] sm:$0xff] %v791_v49  ;;  %v1037_v34 = vadd.f32 %v1036_v12, %v1035_v33 }
 0x230   : > { %v1038_v15 = vpop.f32.mrf.mxu1 }
 0x231   : > { %v796_v23 = vadd.f32 %v1037_v34, %v1702_v3 }
 0x232   : > { %v1039_v35 = vpop.f32.mrf.mxu1 }
 0x233   : > { %846 = vst [vmem:[%s1707_s12 + $0x38] sm:$0xff] %v796_v23  ;;  %v1040_v36 = vadd.f32 %v1039_v35, %v1038_v15 }
 0x234   : > { %v1041_v28 = vpop.f32.mrf.mxu1 }
 0x235   : > { %v801_v38 = vadd.f32 %v1040_v36, %v1702_v3 }
 0x236   : > { %v1042_v39 = vpop.f32.mrf.mxu1 }
 0x237   : > { %847 = vst [vmem:[%s1707_s12 + $0x40] sm:$0xff] %v801_v38  ;;  %v1043_v40 = vadd.f32 %v1042_v39, %v1041_v28 }
 0x238   : > { %v1044_v41 = vpop.f32.mrf.mxu1 }
 0x239   : > { %v806_v44 = vadd.f32 %v1043_v40, %v1702_v3 }
 0x23a   : > { %v1045_v45 = vpop.f32.mrf.mxu1 }
 0x23b   : > { %848 = vst [vmem:[%s1707_s12 + $0x48] sm:$0xff] %v806_v44  ;;  %v1046_v1 = vadd.f32 %v1045_v45, %v1044_v41 }
 0x23c   : > { %v1047_v48 = vpop.f32.mrf.mxu1 }
 0x23d   : > { %v811_v50 = vadd.f32 %v1046_v1, %v1702_v3 }
 0x23e   : > { %v1048_v51 = vpop.f32.mrf.mxu1 }
 0x23f   : > { %849 = vst [vmem:[%s1707_s12 + $0x50] sm:$0xff] %v811_v50  ;;  %v1049_v42 = vadd.f32 %v1048_v51, %v1047_v48 }
 0x240   : > { %v1050_v52 = vpop.f32.mrf.mxu1 }
 0x241   : > { %v816_v54 = vadd.f32 %v1049_v42, %v1702_v3 }
 0x242   : > { %v1051_v21 = vpop.f32.mrf.mxu1 }
 0x243   : > { %850 = vst [vmem:[%s1707_s12 + $0x58] sm:$0xff] %v816_v54  ;;  %v1052_v55 = vadd.f32 %v1051_v21, %v1050_v52 }
 0x244   : > { %v1053_v56 = vpop.f32.mrf.mxu1 }
 0x245   : > { %v821_v7 = vadd.f32 %v1052_v55, %v1702_v3 }
 0x246   : > { %v1054_v43 = vpop.f32.mrf.mxu1 }
 0x247   : > { %851 = vst [vmem:[%s1707_s12 + $0x60] sm:$0xff] %v821_v7  ;;  %v1055_v57 = vadd.f32 %v1054_v43, %v1053_v56 }
 0x248   : > { %v1056_v59 = vpop.f32.mrf.mxu1 }
 0x249   : > { %v826_v60 = vadd.f32 %v1055_v57, %v1702_v3 }
 0x24a   : > { %v1057_v61 = vpop.f32.mrf.mxu1 }
 0x24b   : > { %852 = vst [vmem:[%s1707_s12 + $0x68] sm:$0xff] %v826_v60  ;;  %v1058_v63 = vadd.f32 %v1057_v61, %v1056_v59 }
 0x24c   : > { %v1059_v31 = vpop.f32.mrf.mxu1 }
 0x24d   : > { %v831_v0 = vadd.f32 %v1058_v63, %v1702_v3 }
 0x24e   : > { %v1060_v2 = vpop.f32.mrf.mxu1 }
 0x24f   : > { %853 = vst [vmem:[%s1707_s12 + $0x70] sm:$0xff] %v831_v0  ;;  %v1061_v37 = vadd.f32 %v1060_v2, %v1059_v31 }
 0x251   : > { %v836_v47 = vadd.f32 %v1061_v37, %v1702_v3 }
 0x253   : > { %854 = vst [vmem:[%s1707_s12 + $0x78] sm:$0xff] %v836_v47 }
 0x254   : > { %1293 = shalt.err (!%p1290_p9)
}
 0x255   : > { %s1294_s15 = scalar_lea.hbm %s1743_s11, 2048  ;;  %s1298_s14 = scalar_lea.hbm %s1795_s5, 4096 }
 0x256   : > { %p1295_p13 = scmp.ne.s32.totalorder %s1743_s11, %s1294_s15  ;;  %p1299_p4 = scmp.lt.s32.totalorder %s1743_s11, %s1795_s5 }
 0x257   : > { %p1300_p8 = scmp.lt.s32.totalorder %s1298_s14, %s1294_s15 }
 0x258   : > { %p1296_p5 = pnand %p1295_p13, %p1813_p10 }
 0x259   : > { %p1301_p7 = por %p1300_p8, %p1299_p4 }
 0x25a   : > { %p1297_p0 = pneg %p1296_p5 }
 0x25c   : > { %p1302_p11 = pnand %p1301_p7, %p1297_p0 }
 0x25e   : > { %1305 = shalt.err (!%p1302_p11)
}
 0x25f   : > { %s1359_s16 = smov 128   ;;  %s1360_s9 = smov 8  }
 0x260   : > { %1072 = dma.vmem_to_hbm [thread:$0]  (%p1813_p10), %s1745_s8, 2048, %s1743_s11, %s856_s27, %s1359_s16, %s1359_s16, %s1360_s9  }
 0x261 PF: > { %s884_s30 = sand.u32 1, %s1336_s18   ;;  %p1814_p1 = scmp.ne.s32.totalorder %s1802_s25, 0 }
 0x262   : > { %p1815_p2 = scmp.ge.s32.totalorder %s1348_s21, 2  ;;  %s885_s23 = scalar_lea.sflag [#allocation4], %s884_s30 }
 0x264   : > { %p1086_p6 = pnand %p1815_p2, %p1814_p1 }
 0x266   : > { %p1087_p12 = pneg %p1086_p6 }
 0x268   : > { %1331 = dma.done.wait (%p1087_p12), %s885_s23, 2048  }
 0x269   : > { %1333 = vsyncadd (%p1087_p12), %s885_s23, 4294965248  ;;  %p19_p3 = scmp.ge.s32.totalorder %s1466_s17, 4   ;;  %s1816_s18 = smov %s1340_s19 }
 0x26a   : > { %s1817_s19 = smov %s1344_s20  ;;  %s1818_s20 = smov %s1475_s28 }
 0x26b   : > { %s1819_s21 = smov %s1466_s17  ;;  %21 = sbr.rel (!%p19_p3) target bundleno = 6 (0x6), region = 93 }
 0x270   :  { %890 = vsyncpa [#allocation3], 1 }
 0x271   :  { %892 = vsyncpa [#allocation3 + $0x1], 1 }
 0x272   :  { %893 = vsyncpa [#allocation6], 1 }
 0x273   :  { %894 = vsyncpa [#allocation4], 1 }
 0x274   :  { %896 = vsyncpa [#allocation4 + $0x1], 1 }

</bundles_post_ra>
